<compile_context>
chip_gen: v7x
topology: tpu7x:2x2x1
jax: 0.10.0
libtpu: 0.0.40
codegen_flags: <defaults>
</compile_context>

<pallas_src>
import math

import jax
import jax.numpy as jnp
from jax import lax
from jax.experimental import pallas as pl
from jax.experimental.pallas import tpu as pltpu


def _round_up(x, m):
    return ((x + m - 1) // m) * m


def _pad2(a, rows, cols):
    """Zero-pad a 2-D array up to (rows, cols); no-op if already that shape."""
    pr, pc = rows - a.shape[0], cols - a.shape[1]
    if pr or pc:
        a = jnp.pad(a, ((0, pr), (0, pc)))
    return a


def _lora_linear_kernel(x_ref, w_ref, xa_ref, bT_ref, bias_ref, o_ref):
    """One (i, j, k) grid step of y = x@W^T + xa@B^T + bias.

    o_ref is an f32 (tm, tn) tile resident across the K axis (index_map
    ignores k), used directly as the accumulator.
    xa_ref is the precomputed (tm, r) low-rank projection x @ A_s^T.
    bT_ref is B^T laid out lane-dense as (r, tn).
    """
    k = pl.program_id(2)

    @pl.when(k == 0)
    def _init():
        o_ref[...] = jnp.zeros_like(o_ref)

    # Main matmul: contract over the shared last (K) dim of x (tm, tk) and
    # W (tn, tk); MXU consumes the transposed RHS natively (no XLU transpose).
    o_ref[...] += lax.dot_general(
        x_ref[...], w_ref[...],
        dimension_numbers=(((1,), (1,)), ((), ())),
        preferred_element_type=jnp.float32)

    @pl.when(k == pl.num_programs(2) - 1)
    def _finalize():
        # Low-rank correction (bf16 inputs, f32 accumulate) + bias, once per
        # output tile.
        lora = jnp.dot(xa_ref[...], bT_ref[...],
                       preferred_element_type=jnp.float32)
        o_ref[...] += lora + bias_ref[...]


def lora_linear(x, weight, A, B, bias, *, lora_alpha=16, r=4,
                tm_max=512, tn_max=512, tk_max=1024,
                mxu_dtype=jnp.bfloat16):
    """x: (batch, seq, in_features) -> (batch, seq, out_features)."""
    scaling = (lora_alpha / r) if r > 0 else 1.0
    batch, seq, K = x.shape
    N = weight.shape[0]
    M = batch * seq

    x2d = x.reshape(M, K)

    if r > 0 and A is not None and B is not None:
        # Fold scaling into the rank-r factor and precompute the low-rank
        # projection in f32 (an (M, K) x (K, r) matmul: trivial FLOPs/bytes).
        A_s = A.astype(jnp.float32) * jnp.float32(scaling)
        xa = jnp.dot(x2d.astype(jnp.float32), A_s.T,
                     preferred_element_type=jnp.float32)      # (M, r)
        B_T = B.T                                             # (r, N), lane-dense
        r_eff = r
    else:
        # r == 0: zero rank-1 adapter so the same kernel applies.
        r_eff = 1
        xa = jnp.zeros((M, 1), jnp.float32)
        B_T = jnp.zeros((1, N), weight.dtype)

    if bias is None:
        bias = jnp.zeros((N,), jnp.float32)

    # TODO(synk): lora_dropout is nn.Identity for dropout=0.0; non-zero dropout
    # would need pltpu.prng_random_bits-based masking of the LoRA term.

    # Tile sizes: lane-dense output (tn multiple of 128), K tiles multiple of
    # 128, M tiles multiple of 8, all clamped to the padded problem size.
    # 512x512x1024 bf16 inputs + f32 output double-buffered ~= 6.5 MiB VMEM.
    tm = min(tm_max, _round_up(M, 8))
    tn = min(tn_max, _round_up(N, 128))
    tk = min(tk_max, _round_up(K, 128))

    Mp, Np, Kp = _round_up(M, tm), _round_up(N, tn), _round_up(K, tk)

    x_p = _pad2(x2d, Mp, Kp).astype(mxu_dtype)
    w_p = _pad2(weight, Np, Kp).astype(mxu_dtype)
    xa_p = _pad2(xa, Mp, r_eff).astype(mxu_dtype)
    bT_p = _pad2(B_T, r_eff, Np).astype(mxu_dtype)
    bias_p = _pad2(bias.astype(jnp.float32).reshape(1, N), 1, Np)

    grid = (Mp // tm, Np // tn, Kp // tk)
    # Note (v7x megacore): for decode-like shapes where Mp//tm == 1, shrink tn
    # (or tm) so Mp//tm * Np//tn >= 2 and both TensorCores get work.

    out = pl.pallas_call(
        _lora_linear_kernel,
        out_shape=jax.ShapeDtypeStruct((Mp, Np), jnp.float32),
        grid_spec=pltpu.PrefetchScalarGridSpec(
            num_scalar_prefetch=0,
            grid=grid,
            in_specs=[
                pl.BlockSpec((tm, tk), lambda i, j, k: (i, k)),       # x
                pl.BlockSpec((tn, tk), lambda i, j, k: (j, k)),       # W
                pl.BlockSpec((tm, r_eff), lambda i, j, k: (i, 0)),    # xa (resident over j, k)
                pl.BlockSpec((r_eff, tn), lambda i, j, k: (0, j)),    # B^T (lane-dense)
                pl.BlockSpec((1, tn), lambda i, j, k: (0, j)),        # bias
            ],
            out_specs=pl.BlockSpec((tm, tn), lambda i, j, k: (i, j)),
        ),
        compiler_params=pltpu.CompilerParams(
            dimension_semantics=("parallel", "parallel", "arbitrary"),
        ),
    )(x_p, w_p, xa_p, bT_p, bias_p)

    if Mp != M or Np != N:
        out = out[:M, :N]
    return out.reshape(batch, seq, N)


def _kaiming_uniform(key, shape, a=math.sqrt(5)):
    # Matches torch.nn.init.kaiming_uniform_ for a 2D weight (fan_in = shape[1]).
    fan_in = shape[1]
    gain = math.sqrt(2.0 / (1.0 + a * a))
    bound = gain * math.sqrt(3.0 / fan_in)
    return jax.random.uniform(key, shape, jnp.float32, minval=-bound, maxval=bound)


if __name__ == "__main__":
    # Small shapes consistent with the module.
    batch, seq = 2, 8
    in_features, out_features, r, lora_alpha = 32, 64, 4, 16

    key = jax.random.PRNGKey(0)
    k_x, k_w, k_a, k_b, k_bias = jax.random.split(key, 5)

    weight = _kaiming_uniform(k_w, (out_features, in_features))
    A = _kaiming_uniform(k_a, (r, in_features))
    # Module inits B to zeros; use small nonzero values here so the LoRA path
    # is actually exercised by the correctness check (as after training).
    B = 0.05 * jax.random.normal(k_b, (out_features, r), jnp.float32)
    bias_bound = 1.0 / math.sqrt(in_features)
    bias = jax.random.uniform(
        k_bias, (out_features,), jnp.float32, minval=-bias_bound, maxval=bias_bound
    )

    x = jax.random.normal(k_x, (batch, seq, in_features), jnp.float32)

    y = lora_linear(x, weight, A, B, bias, lora_alpha=lora_alpha, r=r)
    y = jax.block_until_ready(y)

    # Reference in plain f32 JAX (kernel uses bf16 MXU inputs -> relaxed tol).
    scaling = lora_alpha / r
    w_eff = weight + (B @ A) * scaling
    y_ref = (x.reshape(-1, in_features) @ w_eff.T + bias).reshape(
        batch, seq, out_features)
    assert jnp.allclose(y, y_ref, atol=2e-2, rtol=2e-2), "mismatch vs reference"

    print("KERNEL_OK")
</pallas_src>

<mosaic_0001>
module attributes {stable_mosaic.version = 11 : i64} {
  func.func @_lora_linear_kernel(%arg0: i32, %arg1: i32, %arg2: i32, %arg3: memref<16x128xbf16, #tpu.memory_space<vmem>>, %arg4: memref<128x128xbf16, #tpu.memory_space<vmem>>, %arg5: memref<16x4xbf16, #tpu.memory_space<vmem>>, %arg6: memref<4x128xbf16, #tpu.memory_space<vmem>>, %arg7: memref<1x128xf32, #tpu.memory_space<vmem>>, %arg8: memref<16x128xf32, #tpu.memory_space<vmem>>) attributes {dimension_semantics = [#tpu.dimension_semantics<parallel>, #tpu.dimension_semantics<parallel>, #tpu.dimension_semantics<arbitrary>], iteration_bounds = array<i64: 1, 1, 1>, scalar_prefetch = 0 : i64, scratch_operands = 0 : i64, tpu.core_type = #tpu.core_type<tc>, window_params = [{transform_indices = @transform_0, window_bounds = array<i64: 16, 128>}, {transform_indices = @transform_1, window_bounds = array<i64: 128, 128>}, {transform_indices = @transform_2, window_bounds = array<i64: 16, 4>}, {transform_indices = @transform_3, window_bounds = array<i64: 4, 128>}, {transform_indices = @transform_4, window_bounds = array<i64: 1, 128>}, {transform_indices = @transform_5, window_bounds = array<i64: 16, 128>}]} {
    %c0_i32 = arith.constant 0 : i32
    %0 = arith.cmpi eq, %arg2, %c0_i32 : i32
    %1 = arith.extui %0 : i1 to i32
    %c0_i32_0 = arith.constant 0 : i32
    %2 = arith.cmpi ne, %1, %c0_i32_0 : i32
    scf.if %2 {
      %cst_10 = arith.constant 0.000000e+00 : f32
      %12 = vector.broadcast %cst_10 : f32 to vector<16x128xf32>
      %c0_11 = arith.constant 0 : index
      %c0_12 = arith.constant 0 : index
      %13 = vector.load %arg8[%c0_11, %c0_12] : memref<16x128xf32, #tpu.memory_space<vmem>>, vector<16x128xf32>
      tpu.vector_store %arg8[%c0_11, %c0_12], %12 {strides = array<i32>} : memref<16x128xf32, #tpu.memory_space<vmem>>, vector<16x128xf32>,
    } else {
    }
    %c0 = arith.constant 0 : index
    %c0_1 = arith.constant 0 : index
    %3 = vector.load %arg8[%c0, %c0_1] : memref<16x128xf32, #tpu.memory_space<vmem>>, vector<16x128xf32>
    %c0_2 = arith.constant 0 : index
    %c0_3 = arith.constant 0 : index
    %4 = vector.load %arg3[%c0_2, %c0_3] : memref<16x128xbf16, #tpu.memory_space<vmem>>, vector<16x128xbf16>
    %c0_4 = arith.constant 0 : index
    %c0_5 = arith.constant 0 : index
    %5 = vector.load %arg4[%c0_4, %c0_5] : memref<128x128xbf16, #tpu.memory_space<vmem>>, vector<128x128xbf16>
    %cst = arith.constant dense<0.000000e+00> : vector<16x128xf32>
    %6 = tpu.matmul %4, %5, %cst {dimension_numbers = #tpu.dot_dimension_numbers<[1], [1], [0], [0], [0, 0, 1, 0], [], []>} : vector<16x128xbf16>, vector<128x128xbf16>, vector<16x128xf32> -> vector<16x128xf32>
    %7 = arith.addf %3, %6 : vector<16x128xf32>
    %c0_6 = arith.constant 0 : index
    %c0_7 = arith.constant 0 : index
    %8 = vector.load %arg8[%c0_6, %c0_7] : memref<16x128xf32, #tpu.memory_space<vmem>>, vector<16x128xf32>
    tpu.vector_store %arg8[%c0_6, %c0_7], %7 {strides = array<i32>} : memref<16x128xf32, #tpu.memory_space<vmem>>, vector<16x128xf32>,
    %c0_i32_8 = arith.constant 0 : i32
    %9 = arith.cmpi eq, %arg2, %c0_i32_8 : i32
    %10 = arith.extui %9 : i1 to i32
    %c0_i32_9 = arith.constant 0 : i32
    %11 = arith.cmpi ne, %10, %c0_i32_9 : i32
    scf.if %11 {
      %c0_10 = arith.constant 0 : index
      %c0_11 = arith.constant 0 : index
      %12 = vector.load %arg5[%c0_10, %c0_11] : memref<16x4xbf16, #tpu.memory_space<vmem>>, vector<16x4xbf16>
      %c0_12 = arith.constant 0 : index
      %c0_13 = arith.constant 0 : index
      %13 = vector.load %arg6[%c0_12, %c0_13] : memref<4x128xbf16, #tpu.memory_space<vmem>>, vector<4x128xbf16>
      %cst_14 = arith.constant dense<0.000000e+00> : vector<16x128xf32>
      %14 = tpu.matmul %12, %13, %cst_14 {dimension_numbers = #tpu.dot_dimension_numbers<[1], [0], [0], [1], [0, 0, 1, 1], [], []>} : vector<16x4xbf16>, vector<4x128xbf16>, vector<16x128xf32> -> vector<16x128xf32>
      %c0_15 = arith.constant 0 : index
      %c0_16 = arith.constant 0 : index
      %15 = vector.load %arg8[%c0_15, %c0_16] : memref<16x128xf32, #tpu.memory_space<vmem>>, vector<16x128xf32>
      %c0_17 = arith.constant 0 : index
      %c0_18 = arith.constant 0 : index
      %16 = vector.load %arg7[%c0_17, %c0_18] : memref<1x128xf32, #tpu.memory_space<vmem>>, vector<1x128xf32>
      %17 = vector.broadcast %16 : vector<1x128xf32> to vector<16x128xf32>
      %18 = arith.addf %14, %17 : vector<16x128xf32>
      %19 = arith.addf %15, %18 : vector<16x128xf32>
      %c0_19 = arith.constant 0 : index
      %c0_20 = arith.constant 0 : index
      %20 = vector.load %arg8[%c0_19, %c0_20] : memref<16x128xf32, #tpu.memory_space<vmem>>, vector<16x128xf32>
      tpu.vector_store %arg8[%c0_19, %c0_20], %19 {strides = array<i32>} : memref<16x128xf32, #tpu.memory_space<vmem>>, vector<16x128xf32>,
    } else {
    }
    return
  }
  func.func @transform_0(%arg0: i32, %arg1: i32, %arg2: i32) -> (i32, i32) {
    %c0_i32 = arith.constant 0 : i32
    return %arg0, %arg2 : i32, i32
  }
  func.func @transform_1(%arg0: i32, %arg1: i32, %arg2: i32) -> (i32, i32) {
    %c0_i32 = arith.constant 0 : i32
    return %arg1, %arg2 : i32, i32
  }
  func.func @transform_2(%arg0: i32, %arg1: i32, %arg2: i32) -> (i32, i32) {
    %c0_i32 = arith.constant 0 : i32
    %c0_i32_0 = arith.constant 0 : i32
    return %arg0, %c0_i32 : i32, i32
  }
  func.func @transform_3(%arg0: i32, %arg1: i32, %arg2: i32) -> (i32, i32) {
    %c0_i32 = arith.constant 0 : i32
    %c0_i32_0 = arith.constant 0 : i32
    return %c0_i32, %arg1 : i32, i32
  }
  func.func @transform_4(%arg0: i32, %arg1: i32, %arg2: i32) -> (i32, i32) {
    %c0_i32 = arith.constant 0 : i32
    %c0_i32_0 = arith.constant 0 : i32
    return %c0_i32, %arg1 : i32, i32
  }
  func.func @transform_5(%arg0: i32, %arg1: i32, %arg2: i32) -> (i32, i32) {
    %c0_i32 = arith.constant 0 : i32
    return %arg0, %arg1 : i32, i32
  }
}

</mosaic_0001>

<bundles_post_ra>
// kernel: tpu_custom_call.1
= control target key start
LH: loop header
LB: loop body
LE: loop exit
PB: predicated region body
PF: predicated region fallthrough
CT: control target
= control target key end

     0   :  { %10 = vsyncpa [#allocation3], 0  ;;  %s454_s0 = inlined_call_operand.vmem [shape: bf16[16,128], index: 0, kind: input, shape index: {}]   ;;  %s455_s1 = inlined_call_operand.hbm [shape: bf16[128,128], index: 1, kind: input, shape index: {}]   ;;  %s456_s2 = inlined_call_operand.vmem [shape: bf16[16,4], index: 2, kind: input, shape index: {}]   ;;  %s457_s3 = inlined_call_operand.vmem [shape: bf16[4,128], index: 3, kind: input, shape index: {}]   ;;  %s458_s4 = inlined_call_operand.vmem [shape: f32[1,128], index: 4, kind: input, shape index: {}]   ;;  %s459_s5 = inlined_call_operand.hbm [shape: f32[16,128], index: 5, kind: output, shape index: {}]  }
   0x1   :  { %11 = vsyncpa [#allocation4], 0  ;;  %s380_s18 = smov [#allocation2]   ;;  %s332_s22 = scalar_lea.hbm %s455_s1, 1024 }
   0x2   :  { %s19_s19 = sshll.u32 %s380_s18, 4  ;;  %p333_p0 = scmp.ne.s32.totalorder %s455_s1, %s332_s22  ;;  %s20_s19 = int_to_ptr.vmem [resolvable:$true] %s19_s19 }
   0x3   :  { %p336_p1 = scmp.lt.u32.totalorder %s332_s22, %s455_s1 }
   0x5   :  { %p338_p2 = pnand %p336_p1, %p333_p0 }
   0x7   :  { %341 = shalt.err (!%p338_p2)
}
   0x8   :  { %s342_s27 = scalar_lea.vmem %s20_s19, 1024  ;;  %p347_p4 = scmp.lt.s32.totalorder %s20_s19, %s20_s19 }
   0x9   :  { %p343_p3 = scmp.ne.s32.totalorder %s20_s19, %s342_s27  ;;  %p348_p5 = scmp.lt.s32.totalorder %s342_s27, %s342_s27 }
   0xb   :  { %p349_p6 = por %p348_p5, %p347_p4 }
   0xd   :  { %p350_p7 = pnand %p349_p6, %p343_p3 }
   0xf   :  { %353 = shalt.err (!%p350_p7)
}
  0x10   :  { %s381_s28 = smov 64   ;;  %s382_s29 = smov 4  }
  0x11   :  { %25 = dma.hbm_to_vmem [thread:$0]  %s455_s1, 1024, %s20_s19, [#allocation3], %s381_s28, %s381_s28, %s382_s29  }
  0x12   :  { %376 = dma.done.wait [#allocation3], 1024  }
  0x13   :  { %377 = vsyncadd [#allocation3], 4294966272  ;;  %v383_v0 = vmov 0.0   ;;  %vm384_vm0 = vmmov 0   ;;  %v322_v1 = vld [vmem:[#allocation2] sm:$0xff]   ;;  %v323_v2 = vld [vmem:[#allocation2 + $0x8] sm:$0xff]  }
  0x14   :  { %274 = vmatprep.subr.bf16.mxu1 %v383_v0  ;;  %290 = vmatprep.mubr.msk.bf16.mxu1 %vm384_vm0, %v383_v0  ;;  %vm185_vm1 = vcmask 1041408   ;;  %v166_v3 = vld [vmem:[%s457_s3] sm:$0x3]  ;;  %vm181_vm2 = vcmask 31744   ;;  %v324_v6 = vld [vmem:[#allocation2 + $0x10] sm:$0xff]   ;;  %v325_v7 = vld [vmem:[#allocation2 + $0x18] sm:$0xff]  }
  0x15   :  { %294 = vmatprep.subr.bf16.mxu0 %v383_v0  ;;  %296 = vmatprep.mubr.msk.bf16.mxu0 %vm384_vm0, %v383_v0  ;;  %v187_v4 = vsel %vm185_vm1, %v166_v3, 0  ;;  %v331_v5 = vld [vmem:[%s456_s2] sm:$0xff]   ;;  %v327_v9 = vld [vmem:[#allocation2 + $0x28] sm:$0xff]   ;;  %v328_v10 = vld [vmem:[#allocation2 + $0x30] sm:$0xff]   ;;  %s385_s12 = smov [#allocation5]  }
  0x16   :  { %275 = vmatpush3.bf16.xpose.msra.mxu1 %v322_v1  ;;  %295 = vmatpush3.bf16.msra.mxu0 %v187_v4  ;;  %v326_v8 = vld [vmem:[#allocation2 + $0x20] sm:$0xff]   ;;  %v329_v11 = vld [vmem:[#allocation2 + $0x38] sm:$0xff]   ;;  %s239_s13 = sshll.u32 %s385_s12, 4  ;;  %s240_s13 = int_to_ptr.vmem [resolvable:$true] %s239_s13 }
  0x17   :  { %276 = vmatprep.subr.bf16.mxu1 %v383_v0  ;;  %v330_v12 = vld [vmem:[%s454_s0] sm:$0xff]   ;;  %s354_s0 = scalar_lea.vmem %s240_s13, 256  ;;  %p359_p9 = scmp.lt.s32.totalorder %s240_s13, %s240_s13 }
  0x18   :  { %v260_v18 = vld [vmem:[%s458_s4] ss:$0 sm:$0xff]  ;;  %p355_p8 = scmp.ne.s32.totalorder %s240_s13, %s354_s0  ;;  %p360_p10 = scmp.lt.s32.totalorder %s354_s0, %s354_s0 }
  0x19   :  { %297 = vmatmul.mubr.msk.bf16.vlgmr.msra.gmra.mrb[0].mxu0 %vm181_vm2, %v331_v5 }
  0x1a   :  { %p361_p11 = por %p360_p10, %p359_p9 }
  0x1c   :  { %p362_p12 = pnand %p361_p11, %p355_p8 }
  0x1e   :  { %277 = vmatpush3.bf16.xpose.msra.mxu1 %v323_v2 }
  0x1f   :  { %278 = vmatprep.subr.bf16.mxu1 %v383_v0 }
  0x26   :  { %279 = vmatpush3.bf16.xpose.msra.mxu1 %v324_v6 }
  0x27   :  { %280 = vmatprep.subr.bf16.mxu1 %v383_v0 }
  0x2e   :  { %281 = vmatpush3.bf16.xpose.msra.mxu1 %v325_v7 }
  0x2f   :  { %282 = vmatprep.subr.bf16.mxu1 %v383_v0 }
  0x36   :  { %283 = vmatpush3.bf16.xpose.msra.mxu1 %v326_v8 }
  0x37   :  { %284 = vmatprep.subr.bf16.mxu1 %v383_v0 }
  0x3e   :  { %285 = vmatpush3.bf16.xpose.msra.mxu1 %v327_v9 }
  0x3f   :  { %286 = vmatprep.subr.bf16.mxu1 %v383_v0 }
  0x46   :  { %287 = vmatpush3.bf16.xpose.msra.mxu1 %v328_v10 }
  0x47   :  { %288 = vmatprep.subr.bf16.mxu1 %v383_v0 }
  0x4e   :  { %289 = vmatpush3.bf16.xpose.msra.mxu1 %v329_v11 }
  0x55   :  { %291 = vmatmul.mubr.bf16.vlgmr.msra.gmra.mrb[0].mxu1 %v330_v12 }
  0xec   :  { %v223_v13 = vpop.f32.mrb[0].mxu0 }
  0xed   :  { %v298_v14 = vpop.f32.mrb[1].mxu0 }
  0xee   :  { %v226_v15 = vpop.f32.mrb[2].mxu0 }
  0xef   :  { %v299_v16 = vpop.f32.mrb[3].mxu0 }
 0x128   :  { %v150_v17 = vpop.f32.mrb[0].mxu1 }
 0x129   :  { %v292_v19 = vpop.f32.mrb[1].mxu1  ;;  %v303_v22 = vadd.f32 %v260_v18, %v150_v17 }
 0x12a   :  { %v153_v20 = vpop.f32.mrb[2].mxu1 }
 0x12b   :  { %v293_v21 = vpop.f32.mrb[3].mxu1  ;;  %v306_v23 = vadd.f32 %v303_v22, %v223_v13  ;;  %v310_v24 = vadd.f32 %v260_v18, %v153_v20 }
 0x12d   :  { %232 = vst [vmem:[#allocation5] sm:$0xff] %v306_v23  ;;  %v313_v25 = vadd.f32 %v310_v24, %v226_v15 }
 0x12f   :  { %233 = vst [vmem:[#allocation5 + $0x8] sm:$0xff] %v313_v25 }
 0x130   :  { %365 = shalt.err (!%p362_p12)
}
 0x131   :  { %s366_s15 = scalar_lea.hbm %s459_s5, 256 }
 0x132   :  { %p367_p13 = scmp.ne.s32.totalorder %s459_s5, %s366_s15  ;;  %p370_p0 = scmp.lt.u32.totalorder %s366_s15, %s459_s5 }
 0x134   :  { %p372_p1 = pnand %p370_p0, %p367_p13 }
 0x136   :  { %375 = shalt.err (!%p372_p1)
}
 0x137   :  { %s386_s20 = smov 128   ;;  %s387_s21 = smov 8  }
 0x138   :  { %245 = dma.vmem_to_hbm [thread:$0]  %s240_s13, 256, %s459_s5, [#allocation4], %s386_s20, %s386_s20, %s387_s21  }
 0x139   :  { %378 = dma.done.wait [#allocation4], 256  }
 0x13a   :  { %379 = vsyncadd [#allocation4], 4294967040 }
 0x13b   :  { %249 = vsyncpa [#allocation3], 1 }
 0x13c   :  { %250 = vsyncpa [#allocation4], 1 }

</bundles_post_ra>
